<compile_context>
chip_gen: v7x
topology: tpu7x:2x2x1
jax: 0.10.0
libtpu: 0.0.40
codegen_flags: <defaults>
</compile_context>

<pallas_src>
import functools

import jax
import jax.numpy as jnp
from jax.experimental import pallas as pl
from jax.experimental.pallas import tpu as pltpu


def _pos_emb_kernel(x_ref, f_ref, o_ref, *, half, k):
    # x_ref: (TM, k)       positions for this row tile (k packed per row)
    # f_ref: (1, half)     f32 frequency table (resident, same block every step)
    # o_ref: (TM, k*2*half) output tile: k consecutive [cos | sin] groups
    freqs = f_ref[...]                                    # (1, half), float32
    for j in range(k):                                    # k is a small static int
        xj = x_ref[:, j:j + 1].astype(jnp.float32)        # (TM, 1)
        phase = xj * freqs                                # outer product -> (TM, half)
        base = j * 2 * half
        # Two static-slice stores; no concat temp, cast at the store.
        o_ref[:, base:base + half] = jnp.cos(phase).astype(o_ref.dtype)
        o_ref[:, base + half:base + 2 * half] = jnp.sin(phase).astype(o_ref.dtype)


def _round_up(v, m):
    return ((v + m - 1) // m) * m


def _cdiv(a, b):
    return -(-a // b)


def positional_embedding(x, num_channels, max_positions=10000, endpoint=False,
                         *, tile_rows=1024, out_dtype=None):
    """x: 1-D array of shape (N,). Returns (N, num_channels)."""
    assert num_channels % 2 == 0, "num_channels must be even"
    half = num_channels // 2
    if endpoint:
        assert half > 1, "endpoint=True requires num_channels >= 4 (avoids div by zero)"

    n = int(x.shape[0])
    out_dtype = x.dtype if out_dtype is None else jnp.dtype(out_dtype)

    # Lane-dense packing: fold k positions into one kernel row when C < 128 so
    # the output block width is >= 128 lanes (unmasked writeback DMA).
    k = 1
    if num_channels < 128 and 128 % num_channels == 0:
        kk = 128 // num_channels
        if kk > 1 and n % kk == 0:
            k = kk
    n_rows = n // k
    row_width = k * num_channels

    # Row tile: multiple of 8 (sublane).  VMEM budget cap: double-buffered out
    # (2 * tm * row_width * 4 B in f32) plus cos/sin/phase intermediates
    # ~ 16 B * row_width per row; keep under ~8 MiB so it fits v5e's 16 MiB
    # scoped default and v7x's smaller (64 MiB physical) VMEM with headroom.
    vmem_budget = 8 * 1024 * 1024
    tm_cap = max(8, vmem_budget // (16 * row_width))
    tm = max(8, min(int(tile_rows), tm_cap, _round_up(n_rows, 8)))
    if n_rows >= 16:
        # Force >= 2 grid steps: lets v7x's two TensorCores split the grid and
        # overlaps writeback of tile i-1 with compute of tile i everywhere.
        tm = min(tm, _round_up(_cdiv(n_rows, 2), 8))
    tm = _round_up(tm, 8)
    grid = (_cdiv(n_rows, tm),)

    # Positions packed as (n_rows, k); k consecutive positions per kernel row.
    x2d = x.reshape(n_rows, k)

    # Precompute the f32 frequency table once (hoisted out of the kernel body).
    freqs = jnp.arange(half, dtype=jnp.float32)
    freqs = freqs / jnp.float32(half - (1 if endpoint else 0))
    freqs = jnp.power(jnp.float32(1.0 / max_positions), freqs).reshape(1, half)

    in_itemsize = jnp.dtype(x.dtype).itemsize
    out_itemsize = out_dtype.itemsize
    cost = pl.CostEstimate(
        flops=n * half,                      # outer-product multiplies
        transcendentals=2 * n * half,        # one cos + one sin per output element
        bytes_accessed=n * in_itemsize + half * 4 + n * num_channels * out_itemsize,
    )

    kernel = functools.partial(_pos_emb_kernel, half=half, k=k)

    out = pl.pallas_call(
        kernel,
        out_shape=jax.ShapeDtypeStruct((n_rows, row_width), out_dtype),
        grid_spec=pl.GridSpec(
            grid=grid,
            in_specs=[
                # (tm, k): last dim equals full array dim (k); tm is a multiple of 8.
                pl.BlockSpec((tm, k), lambda i: (i, 0)),
                # (1, half): block equals full array dims; resident frequency table.
                pl.BlockSpec((1, half), lambda i: (0, 0)),
            ],
            # (tm, row_width): channel dim is the full array width -> lane-dense
            # writeback whenever row_width is a multiple of 128.
            out_specs=pl.BlockSpec((tm, row_width), lambda i: (i, 0)),
        ),
        compiler_params=pltpu.CompilerParams(
            # Row tiles are independent: lets v7x's two TensorCores split the grid.
            dimension_semantics=("parallel",),
        ),
        cost_estimate=cost,
    )(x2d, freqs)

    # Free row-major reshape back to the (N, C) logical view.
    return out.reshape(n, num_channels)


def positional_embedding_ref(x, num_channels, max_positions=10000, endpoint=False):
    half = num_channels // 2
    freqs = jnp.arange(half, dtype=jnp.float32)
    freqs = freqs / (half - (1 if endpoint else 0))
    freqs = (1.0 / max_positions) ** freqs
    phase = jnp.outer(x.astype(jnp.float32), freqs)
    out = jnp.concatenate([jnp.cos(phase), jnp.sin(phase)], axis=1)
    return out.astype(x.dtype)


if __name__ == "__main__":
    key = jax.random.PRNGKey(0)
    N = 8
    NUM_CHANNELS = 32  # module's num_channels; C//2 = 16 freqs

    # Deterministic example "timestep" inputs.
    x = jax.random.uniform(key, (N,), dtype=jnp.float32) * 100.0

    out = positional_embedding(x, NUM_CHANNELS)
    out = jax.block_until_ready(out)

    ref = positional_embedding_ref(x, NUM_CHANNELS)
    assert out.shape == (N, NUM_CHANNELS), out.shape
    assert jnp.allclose(out, ref, atol=5e-4, rtol=1e-5), (
        float(jnp.max(jnp.abs(out - ref)))
    )
    print("KERNEL_OK")
</pallas_src>

<mosaic_0001>
module attributes {stable_mosaic.version = 11 : i64} {
  func.func @_pos_emb_kernel(%arg0: i32, %arg1: memref<8x4xf32, #tpu.memory_space<vmem>>, %arg2: memref<1x16xf32, #tpu.memory_space<vmem>>, %arg3: memref<8x128xf32, #tpu.memory_space<vmem>>) attributes {dimension_semantics = [#tpu.dimension_semantics<parallel>], iteration_bounds = array<i64: 1>, scalar_prefetch = 0 : i64, scratch_operands = 0 : i64, tpu.core_type = #tpu.core_type<tc>, window_params = [{transform_indices = @transform_0, window_bounds = array<i64: 8, 4>}, {pipeline_mode = #tpu.pipeline_mode<synchronous>, transform_indices = @transform_1, window_bounds = array<i64: 1, 16>}, {transform_indices = @transform_2, window_bounds = array<i64: 8, 128>}]} {
    %c0 = arith.constant 0 : index
    %c0_0 = arith.constant 0 : index
    %0 = vector.load %arg2[%c0, %c0_0] : memref<1x16xf32, #tpu.memory_space<vmem>>, vector<1x16xf32>
    %c0_1 = arith.constant 0 : index
    %c0_2 = arith.constant 0 : index
    %1 = vector.load %arg1[%c0_1, %c0_2] : memref<8x4xf32, #tpu.memory_space<vmem>>, vector<8x1xf32>
    %2 = vector.broadcast %1 : vector<8x1xf32> to vector<8x16xf32>
    %3 = vector.broadcast %0 : vector<1x16xf32> to vector<8x16xf32>
    %4 = arith.mulf %2, %3 : vector<8x16xf32>
    %5 = math.cos %4 : vector<8x16xf32>
    %c0_3 = arith.constant 0 : index
    %c0_4 = arith.constant 0 : index
    %6 = vector.load %arg3[%c0_3, %c0_4] : memref<8x128xf32, #tpu.memory_space<vmem>>, vector<8x16xf32>
    tpu.vector_store %arg3[%c0_3, %c0_4], %5 {strides = array<i32>} : memref<8x128xf32, #tpu.memory_space<vmem>>, vector<8x16xf32>,
    %7 = math.sin %4 : vector<8x16xf32>
    %c0_5 = arith.constant 0 : index
    %c16 = arith.constant 16 : index
    %8 = vector.load %arg3[%c0_5, %c16] : memref<8x128xf32, #tpu.memory_space<vmem>>, vector<8x16xf32>
    tpu.vector_store %arg3[%c0_5, %c16], %7 {strides = array<i32>} : memref<8x128xf32, #tpu.memory_space<vmem>>, vector<8x16xf32>,
    %c0_6 = arith.constant 0 : index
    %c1 = arith.constant 1 : index
    %9 = vector.load %arg1[%c0_6, %c1] : memref<8x4xf32, #tpu.memory_space<vmem>>, vector<8x1xf32>
    %10 = vector.broadcast %9 : vector<8x1xf32> to vector<8x16xf32>
    %11 = vector.broadcast %0 : vector<1x16xf32> to vector<8x16xf32>
    %12 = arith.mulf %10, %11 : vector<8x16xf32>
    %13 = math.cos %12 : vector<8x16xf32>
    %c0_7 = arith.constant 0 : index
    %c32 = arith.constant 32 : index
    %14 = vector.load %arg3[%c0_7, %c32] : memref<8x128xf32, #tpu.memory_space<vmem>>, vector<8x16xf32>
    tpu.vector_store %arg3[%c0_7, %c32], %13 {strides = array<i32>} : memref<8x128xf32, #tpu.memory_space<vmem>>, vector<8x16xf32>,
    %15 = math.sin %12 : vector<8x16xf32>
    %c0_8 = arith.constant 0 : index
    %c48 = arith.constant 48 : index
    %16 = vector.load %arg3[%c0_8, %c48] : memref<8x128xf32, #tpu.memory_space<vmem>>, vector<8x16xf32>
    tpu.vector_store %arg3[%c0_8, %c48], %15 {strides = array<i32>} : memref<8x128xf32, #tpu.memory_space<vmem>>, vector<8x16xf32>,
    %c0_9 = arith.constant 0 : index
    %c2 = arith.constant 2 : index
    %17 = vector.load %arg1[%c0_9, %c2] : memref<8x4xf32, #tpu.memory_space<vmem>>, vector<8x1xf32>
    %18 = vector.broadcast %17 : vector<8x1xf32> to vector<8x16xf32>
    %19 = vector.broadcast %0 : vector<1x16xf32> to vector<8x16xf32>
    %20 = arith.mulf %18, %19 : vector<8x16xf32>
    %21 = math.cos %20 : vector<8x16xf32>
    %c0_10 = arith.constant 0 : index
    %c64 = arith.constant 64 : index
    %22 = vector.load %arg3[%c0_10, %c64] : memref<8x128xf32, #tpu.memory_space<vmem>>, vector<8x16xf32>
    tpu.vector_store %arg3[%c0_10, %c64], %21 {strides = array<i32>} : memref<8x128xf32, #tpu.memory_space<vmem>>, vector<8x16xf32>,
    %23 = math.sin %20 : vector<8x16xf32>
    %c0_11 = arith.constant 0 : index
    %c80 = arith.constant 80 : index
    %24 = vector.load %arg3[%c0_11, %c80] : memref<8x128xf32, #tpu.memory_space<vmem>>, vector<8x16xf32>
    tpu.vector_store %arg3[%c0_11, %c80], %23 {strides = array<i32>} : memref<8x128xf32, #tpu.memory_space<vmem>>, vector<8x16xf32>,
    %c0_12 = arith.constant 0 : index
    %c3 = arith.constant 3 : index
    %25 = vector.load %arg1[%c0_12, %c3] : memref<8x4xf32, #tpu.memory_space<vmem>>, vector<8x1xf32>
    %26 = vector.broadcast %25 : vector<8x1xf32> to vector<8x16xf32>
    %27 = vector.broadcast %0 : vector<1x16xf32> to vector<8x16xf32>
    %28 = arith.mulf %26, %27 : vector<8x16xf32>
    %29 = math.cos %28 : vector<8x16xf32>
    %c0_13 = arith.constant 0 : index
    %c96 = arith.constant 96 : index
    %30 = vector.load %arg3[%c0_13, %c96] : memref<8x128xf32, #tpu.memory_space<vmem>>, vector<8x16xf32>
    tpu.vector_store %arg3[%c0_13, %c96], %29 {strides = array<i32>} : memref<8x128xf32, #tpu.memory_space<vmem>>, vector<8x16xf32>,
    %31 = math.sin %28 : vector<8x16xf32>
    %c0_14 = arith.constant 0 : index
    %c112 = arith.constant 112 : index
    %32 = vector.load %arg3[%c0_14, %c112] : memref<8x128xf32, #tpu.memory_space<vmem>>, vector<8x16xf32>
    tpu.vector_store %arg3[%c0_14, %c112], %31 {strides = array<i32>} : memref<8x128xf32, #tpu.memory_space<vmem>>, vector<8x16xf32>,
    return
  }
  func.func @transform_0(%arg0: i32) -> (i32, i32) {
    %c0_i32 = arith.constant 0 : i32
    %c0_i32_0 = arith.constant 0 : i32
    return %arg0, %c0_i32 : i32, i32
  }
  func.func @transform_1(%arg0: i32) -> (i32, i32) {
    %c0_i32 = arith.constant 0 : i32
    %c0_i32_0 = arith.constant 0 : i32
    %c0_i32_1 = arith.constant 0 : i32
    return %c0_i32, %c0_i32_0 : i32, i32
  }
  func.func @transform_2(%arg0: i32) -> (i32, i32) {
    %c0_i32 = arith.constant 0 : i32
    %c0_i32_0 = arith.constant 0 : i32
    return %arg0, %c0_i32 : i32, i32
  }
}

</mosaic_0001>

<bundles_post_ra>
// kernel: tpu_custom_call.1
= control target key start
LH: loop header
LB: loop body
LE: loop exit
PB: predicated region body
PF: predicated region fallthrough
CT: control target
= control target key end

     0   :  { %7 = vsyncpa [#allocation3], 0  ;;  %s1458_s0 = inlined_call_operand.hbm [shape: f32[2,4], index: 0, kind: input, shape index: {}]   ;;  %s1459_s1 = inlined_call_operand.vmem [shape: f32[1,16], index: 1, kind: input, shape index: {}]   ;;  %s1460_s2 = inlined_call_operand.hbm [shape: f32[2,128], index: 2, kind: output, shape index: {}]  }
   0x1   :  { %8 = vsyncpa [#allocation4], 0 }
   0x2   :  { %13 = vsyncadd [#allocation3], 96  ;;  %s1088_s9 = smov [#allocation2]   ;;  %s1040_s13 = scalar_lea.hbm %s1458_s0, 32 }
   0x3   :  { %s14_s10 = sshll.u32 %s1088_s9, 4  ;;  %p1041_p0 = scmp.ne.s32.totalorder %s1458_s0, %s1040_s13  ;;  %s15_s10 = int_to_ptr.vmem [resolvable:$true] %s14_s10 }
   0x4   :  { %p1044_p1 = scmp.lt.u32.totalorder %s1040_s13, %s1458_s0 }
   0x6   :  { %p1046_p2 = pnand %p1044_p1, %p1041_p0 }
   0x8   :  { %1049 = shalt.err (!%p1046_p2)
}
   0x9   :  { %s1050_s18 = scalar_lea.vmem %s15_s10, 32  ;;  %s1054_s19 = scalar_lea.vmem %s15_s10, 128 }
   0xa   :  { %p1051_p3 = scmp.ne.s32.totalorder %s15_s10, %s1050_s18  ;;  %p1055_p4 = scmp.lt.s32.totalorder %s15_s10, %s15_s10 }
   0xb   :  { %p1056_p5 = scmp.lt.s32.totalorder %s1054_s19, %s1050_s18 }
   0xd   :  { %p1057_p6 = por %p1056_p5, %p1055_p4 }
   0xf   :  { %p1058_p7 = pnand %p1057_p6, %p1051_p3 }
  0x11   :  { %1061 = shalt.err (!%p1058_p7)
}
  0x12   :  { %s1089_s20 = smov 32   ;;  %s1090_s21 = smov 2  }
  0x13   :  { %20 = dma.hbm_to_vmem [thread:$0]  %s1458_s0, 32, %s15_s10, [#allocation3], %s1089_s20, %s1089_s20, %s1090_s21  }
  0x14   :  { %1084 = dma.done.wait [#allocation3], 128  }
  0x15   :  { %1085 = vsyncadd [#allocation3], 4294967168  ;;  %v1091_v0 = vmov 2   ;;  %v1092_v1 = vmov 0   ;;  %v481_v2 = vld [vmem:[#allocation2] sm:$0xff]  ;;  %v1093_v3 = vmov 3  }
  0x16   :  { %1021 = vset.pattern.permute.xlu1 %v1091_v0  ;;  %1019 = vset.pattern.permute.xlu0 %v1092_v1  ;;  %v1094_v4 = vmov 1   ;;  %v950_v5 = vld [vmem:[%s1459_s1] ss:$0 sm:$0xff]  ;;  %v1095_v42 = vmov 683565275   ;;  %s1101_s0 = smov 16  }
  0x17   :  { %484 = vperm.xlu1 %1021, %v481_v2   ;;  %30 = vperm.xlu0 %1019, %v481_v2   ;;  %v1096_v44 = vmov 2475754826   ;;  %v1097_v46 = vmov 2131351028   ;;  %v1098_v48 = vmov 2102212464  }
  0x18   :  { %v1099_v50 = vmov 920167782   ;;  %v1100_v58 = vmov 1326507024   ;;  %s1102_s1 = smov 48   ;;  %s1103_s26 = smov 64  }
  0x19   :  { %s1104_s27 = smov 80   ;;  %s1105_s28 = smov 96  }
  0x1a   :  { %s1106_s29 = smov 112  }
  0x1b   :  { %1022 = vset.pattern.permute.xlu1 %v1093_v3  ;;  %1020 = vset.pattern.permute.xlu0 %v1094_v4 }
  0x1c   :  { %710 = vperm.xlu1 %1022, %v481_v2   ;;  %258 = vperm.xlu0 %1020, %v481_v2  }
  0x20   :  { %1023 = vset.pattern.permute.xlu0 %v1093_v3 }
  0x96   :  { %v485_v6 = vpop.permute.xlu1 %484  ;;  %v31_v7 = vpop.permute.xlu0 %30 }
  0x97   :  { %v1141_v8 = vmul.f32 %v950_v5, %v485_v6  ;;  %v1143_v9 = vmul.f32 %v950_v5, %v31_v7 }
  0x99   :  { %v488_v10 = vand.u32 2147483647, %v1141_v8  ;;  %v491_v11 = vand.u32 2139095040, %v1141_v8  ;;  %v40_v12 = vand.u32 2147483647, %v1143_v9  ;;  %v43_v13 = vand.u32 2139095040, %v1143_v9 }
  0x9b   :  { %v492_v14 = vshrl.u32 %v491_v11, 23  ;;  %v495_v15 = vand.u32 8388607, %v488_v10  ;;  %v47_v16 = vand.u32 8388607, %v40_v12  ;;  %v711_v17 = vpop.permute.xlu1 %710  ;;  %v44_v18 = vshrl.u32 %v43_v13, 23  ;;  %v259_v21 = vpop.permute.xlu0 %258 }
  0x9c   :  { %v1153_v19 = vmul.f32 %v950_v5, %v711_v17  ;;  %v1157_v30 = vmul.f32 %v950_v5, %v259_v21 }
  0x9d   :  { %v967_v20 = vadd.s32 4294967169, %v492_v14  ;;  %v496_v22 = vor.u32 8388608, %v495_v15  ;;  %v951_v23 = vadd.s32 4294967169, %v44_v18  ;;  %v48_v26 = vor.u32 8388608, %v47_v16 }
  0x9e   :  { %v717_v24 = vand.u32 2139095040, %v1153_v19  ;;  %v714_v28 = vand.u32 2147483647, %v1153_v19  ;;  %v265_v40 = vand.u32 2139095040, %v1157_v30 }
  0x9f   :  { %v498_v25 = vadd.s32 1, %v967_v20  ;;  %v50_v27 = vadd.s32 1, %v951_v23  ;;  %v1159_v32 = vshll.u32 %v496_v22, 8  ;;  %v1161_v36 = vshll.u32 %v48_v26, 8 }
  0xa0   :  { %v718_v29 = vshrl.u32 %v717_v24, 23  ;;  %v1167_v39 = vand.u32 8388607, %v714_v28 }
  0xa1   :  { %vm499_vm0 = vcmp.gt.s32.totalorder %v498_v25, 0  ;;  %vm51_vm1 = vcmp.gt.s32.totalorder %v50_v27, 0 }
  0xa2   :  { %v500_v31 = vsel %vm499_vm0, %v498_v25, 0  ;;  %v52_v35 = vsel %vm51_vm1, %v50_v27, 0  ;;  %v975_v38 = vadd.s32 4294967169, %v718_v29 }
  0xa3   :  { %v501_v33 = vshrl.u32 %v500_v31, 5  ;;  %v502_v34 = vand.u32 31, %v500_v31  ;;  %v1163_v37 = vand.u32 31, %v52_v35  ;;  %v1175_v52 = vshrl.u32 %v52_v35, 5 }
  0xa4   :  { %v724_v2 = vadd.s32 1, %v975_v38 }
  0xa5   :  { %v503_v41 = vsub.s32 32, %v502_v34  ;;  %v505_v43 = vshll.u32 %v1095_v42, %v502_v34  ;;  %v508_v45 = vshll.u32 %v1096_v44, %v502_v34  ;;  %v511_v47 = vshll.u32 %v1097_v46, %v502_v34 }
  0xa6   :  { %v514_v49 = vshll.u32 %v1098_v48, %v502_v34  ;;  %v517_v51 = vshll.u32 %v1099_v50, %v502_v34  ;;  %vm520_vm2 = vcmp.lt.s32.totalorder %v501_v33, 1  ;;  %vm522_vm3 = vcmp.lt.s32.totalorder %v501_v33, 3 }
  0xa7   :  { %v504_v53 = vshrl.u32 %v1095_v42, %v503_v41  ;;  %v506_v54 = vshrl.u32 %v1096_v44, %v503_v41  ;;  %v509_v55 = vshrl.u32 %v1097_v46, %v503_v41  ;;  %v512_v56 = vshrl.u32 %v1098_v48, %v503_v41 }
  0xa8   :  { %v515_v57 = vshrl.u32 %v1099_v50, %v503_v41  ;;  %v518_v59 = vshrl.u32 %v1100_v58, %v503_v41  ;;  %vm523_vm4 = vcmp.lt.s32.totalorder %v501_v33, 4  ;;  %v55_v63 = vsub.s32 32, %v1163_v37 }
  0xa9   :  { %v507_v60 = vor.u32 %v506_v54, %v505_v43  ;;  %v510_v61 = vor.u32 %v509_v55, %v508_v45  ;;  %v513_v62 = vor.u32 %v512_v56, %v511_v47  ;;  %vm521_vm5 = vcmp.lt.s32.totalorder %v501_v33, 2 }
  0xaa   :  { %v516_v0 = vor.u32 %v515_v57, %v514_v49  ;;  %v519_v1 = vor.u32 %v518_v59, %v517_v51  ;;  %v57_v14 = vshll.u32 %v1095_v42, %v1163_v37  ;;  %v58_v17 = vshrl.u32 %v1096_v44, %v55_v63 }
  0xab   :  { %v524_v3 = vsel %vm520_vm2, %v504_v53, %v507_v60  ;;  %v525_v4 = vsel %vm523_vm4, %v513_v62, 2102212464  ;;  %v528_v5 = vsel %vm520_vm2, %v507_v60, %v510_v61  ;;  %v532_v6 = vsel %vm520_vm2, %v510_v61, %v513_v62 }
  0xac   :  { %v526_v7 = vsel %vm522_vm3, %v510_v61, %v525_v4  ;;  %v529_v11 = vsel %vm523_vm4, %v516_v0, 920167782  ;;  %v533_v13 = vsel %vm523_vm4, %v519_v1, 1326507024  ;;  %v60_v18 = vshll.u32 %v1096_v44, %v1163_v37 }
  0xad   :  { %v530_v15 = vsel %vm522_vm3, %v513_v62, %v529_v11  ;;  %v534_v16 = vsel %vm522_vm3, %v516_v0, %v533_v13  ;;  %v527_v20 = vsel %vm521_vm5, %v524_v3, %v526_v7  ;;  %v61_v23 = vshrl.u32 %v1097_v46, %v55_v63 }
  0xae   :  { %v531_v21 = vsel %vm521_vm5, %v528_v5, %v530_v15  ;;  %v535_v22 = vsel %vm521_vm5, %v532_v6, %v534_v16  ;;  %v59_v29 = vor.u32 %v58_v17, %v57_v14  ;;  %v63_v34 = vshll.u32 %v1097_v46, %v1163_v37 }
  0xaf   :  { %v1200_v24 = vmul.u32.u64.low %v1159_v32, %v535_v22  ;;  %v1201_v25 = vmul.u32.u64.high %v1159_v32, %v535_v22, %v1200_v24  ;;  %v1204_v26 = vmul.u32.u64.low %v1159_v32, %v531_v21  ;;  %v1205_v27 = vmul.u32.u64.high %v1159_v32, %v531_v21, %v1204_v26 }
  0xb0   :  { %v62_v31 = vor.u32 %v61_v23, %v60_v18  ;;  %v64_v35 = vshrl.u32 %v1098_v48, %v55_v63  ;;  %v56_v33 = vshrl.u32 %v1095_v42, %v55_v63  ;;  %v66_v38 = vshll.u32 %v1098_v48, %v1163_v37 }
  0xb1   :  { %v67_v41 = vshrl.u32 %v1099_v50, %v55_v63  ;;  %v70_v43 = vshrl.u32 %v1100_v58, %v55_v63  ;;  %v543_v45 = vmul.u32 %v1159_v32, %v527_v20  ;;  %v69_v49 = vshll.u32 %v1099_v50, %v1163_v37 }
  0xb2   :  { %v65_v47 = vor.u32 %v64_v35, %v63_v34  ;;  %vm72_vm6 = vcmp.lt.s32.totalorder %v1175_v52, 1  ;;  %vm545_vm7 = vc.u32 %v1201_v25, %v1204_v26  ;;  %v546_v51 = vadd.s32 1, %v1205_v27 }
  0xb3   :  { %v68_v53 = vor.u32 %v67_v41, %v66_v38  ;;  %vm73_vm8 = vcmp.lt.s32.totalorder %v1175_v52, 2  ;;  %v71_v54 = vor.u32 %v70_v43, %v69_v49  ;;  %vm74_vm9 = vcmp.lt.s32.totalorder %v1175_v52, 3 }
  0xb4   :  { %vm75_vm10 = vcmp.lt.s32.totalorder %v1175_v52, 4  ;;  %v80_v32 = vsel %vm72_vm6, %v59_v29, %v62_v31  ;;  %v547_v55 = vsel %vm545_vm7, %v546_v51, %v1205_v27  ;;  %v84_v57 = vsel %vm72_vm6, %v62_v31, %v65_v47 }
  0xb5   :  { %v77_v56 = vsel %vm75_vm10, %v65_v47, 2102212464  ;;  %v81_v37 = vsel %vm75_vm10, %v68_v53, 920167782  ;;  %v548_v59 = vadd.s32 %v547_v55, %v543_v45  ;;  %v76_v60 = vsel %vm72_vm6, %v56_v33, %v59_v29 }
  0xb6   :  { %v82_v61 = vsel %vm74_vm9, %v65_v47, %v81_v37  ;;  %v85_v62 = vsel %vm75_vm10, %v71_v54, 1326507024  ;;  %v78_v63 = vsel %vm74_vm9, %v62_v31, %v77_v56  ;;  %vm725_vm11 = vcmp.gt.s32.totalorder %v724_v2, 0 }
  0xb7   :  { %v83_v0 = vsel %vm73_vm8, %v80_v32, %v82_v61  ;;  %v86_v1 = vsel %vm74_vm9, %v68_v53, %v85_v62  ;;  %v549_v3 = vadd.s32 536870912, %v548_v59  ;;  %v726_v13 = vsel %vm725_vm11, %v724_v2, 0 }
  0xb8   :  { %v87_v4 = vsel %vm73_vm8, %v84_v57, %v86_v1  ;;  %v1232_v5 = vmul.u32.u64.low %v1161_v36, %v83_v0  ;;  %v1233_v6 = vmul.u32.u64.high %v1161_v36, %v83_v0, %v1232_v5  ;;  %v79_v15 = vsel %vm73_vm8, %v76_v60, %v78_v63 }
  0xb9   :  { %v1237_v7 = vmul.u32.u64.low %v1161_v36, %v87_v4  ;;  %v1238_v11 = vmul.u32.u64.high %v1161_v36, %v87_v4, %v1237_v7  ;;  %v1240_v14 = vshrl.u32 %v549_v3, 30  ;;  %v728_v16 = vand.u32 31, %v726_v13 }
  0xba   :  { %v266_v17 = vshrl.u32 %v265_v40, 23  ;;  %v98_v18 = vadd.s32 1, %v1233_v6  ;;  %v722_v20 = vor.u32 8388608, %v1167_v39  ;;  %v95_v23 = vmul.u32 %v1161_v36, %v79_v15 }
  0xbb   :  { %v729_v21 = vsub.s32 32, %v728_v16  ;;  %v731_v22 = vshll.u32 %v1095_v42, %v728_v16  ;;  %vm97_vm12 = vc.u32 %v1238_v11, %v1232_v5  ;;  %v734_v2 = vshll.u32 %v1096_v44, %v728_v16 }
  0xbc   :  { %v737_v52 = vshll.u32 %v1097_v46, %v728_v16  ;;  %v551_v24 = vshll.u32 %v1240_v14, 30  ;;  %v99_v40 = vsel %vm97_vm12, %v98_v18, %v1233_v6  ;;  %v727_v27 = vshrl.u32 %v726_v13, 5 }
  0xbd   :  { %v732_v29 = vshrl.u32 %v1096_v44, %v729_v21  ;;  %v100_v39 = vadd.s32 %v99_v40, %v95_v23  ;;  %v735_v31 = vshrl.u32 %v1097_v46, %v729_v21  ;;  %v738_v34 = vshrl.u32 %v1098_v48, %v729_v21 }
  0xbe   :  { %v740_v36 = vshll.u32 %v1098_v48, %v728_v16  ;;  %v741_v33 = vshrl.u32 %v1099_v50, %v729_v21  ;;  %v743_v38 = vshll.u32 %v1099_v50, %v728_v16  ;;  %v959_v41 = vadd.s32 4294967169, %v266_v17 }
  0xbf   :  { %v733_v35 = vor.u32 %v732_v29, %v731_v22  ;;  %v101_v43 = vadd.s32 536870912, %v100_v39  ;;  %v736_v45 = vor.u32 %v735_v31, %v734_v2  ;;  %v739_v47 = vor.u32 %v738_v34, %v737_v52 }
  0xc0   :  { %v744_v49 = vshrl.u32 %v1100_v58, %v729_v21  ;;  %v1263_v51 = vsub.s32 %v548_v59, %v551_v24  ;;  %v730_v53 = vshrl.u32 %v1095_v42, %v729_v21  ;;  %v742_v54 = vor.u32 %v741_v33, %v740_v36 }
  0xc1   :  { %vm746_vm13 = vcmp.lt.s32.totalorder %v727_v27, 1  ;;  %v1266_v32 = vshrl.u32 %v101_v43, 30  ;;  %vm748_vm14 = vcmp.lt.s32.totalorder %v727_v27, 3  ;;  %vm749_vm15 = vcmp.lt.s32.totalorder %v727_v27, 4 }
  0xc2   :  { %v745_v55 = vor.u32 %v744_v49, %v743_v38  ;;  %vm747_vm0 = vcmp.lt.s32.totalorder %v727_v27, 2  ;;  %v751_v56 = vsel %vm749_vm15, %v739_v47, 2102212464  ;;  %v754_v37 = vsel %vm746_vm13, %v733_v35, %v736_v45 }
  0xc3   :  { %v762_v57 = vshll.u32 %v722_v20, 8  ;;  %v103_v60 = vshll.u32 %v1266_v32, 30  ;;  %v755_v61 = vsel %vm749_vm15, %v742_v54, 920167782  ;;  %v758_v62 = vsel %vm746_vm13, %v736_v45, %v739_v47 }
  0xc4   :  { %v272_v63 = vadd.s32 1, %v959_v41  ;;  %v554_v59 = vsub.s32 0, %v1263_v51  ;;  %v750_v0 = vsel %vm746_vm13, %v730_v53, %v733_v35  ;;  %v756_v1 = vsel %vm748_vm14, %v739_v47, %v755_v61 }
  0xc5   :  { %v759_v3 = vsel %vm749_vm15, %v745_v55, 1326507024  ;;  %v104_v4 = vsub.s32 %v100_v39, %v103_v60  ;;  %v752_v6 = vsel %vm748_vm14, %v736_v45, %v751_v56  ;;  %v757_v7 = vsel %vm747_vm0, %v754_v37, %v756_v1 }
  0xc6   :  { %v760_v13 = vsel %vm748_vm14, %v742_v54, %v759_v3  ;;  %v1275_v16 = vmul.u32.u64.low %v762_v57, %v757_v7  ;;  %v1276_v17 = vmul.u32.u64.high %v762_v57, %v757_v7, %v1275_v16  ;;  %v753_v22 = vsel %vm747_vm0, %v750_v0, %v752_v6 }
  0xc7   :  { %v761_v15 = vsel %vm747_vm0, %v758_v62, %v760_v13  ;;  %v106_v18 = vsub.s32 0, %v104_v4  ;;  %vm273_vm1 = vcmp.gt.s32.totalorder %v272_v63, 0  ;;  %v968_v23 = vmin.u32 %v554_v59, %v1263_v51 }
  0xc8   :  { %v1279_v20 = vmul.u32.u64.low %v762_v57, %v761_v15  ;;  %v1280_v21 = vmul.u32.u64.high %v762_v57, %v761_v15, %v1279_v20  ;;  %v274_v52 = vsel %vm273_vm1, %v272_v63, 0  ;;  %v772_v24 = vadd.s32 1, %v1276_v17 }
  0xc9   :  { %v952_v2 = vmin.u32 %v106_v18, %v104_v4  ;;  %v769_v29 = vmul.u32 %v762_v57, %v753_v22  ;;  %v276_v39 = vand.u32 31, %v274_v52  ;;  %v556_v34 = vclz %v968_v23 }
  0xca   :  { %vm771_vm2 = vc.u32 %v1280_v21, %v1275_v16  ;;  %v96_v38 = vadd.s32 %v1232_v5, %v1238_v11  ;;  %v262_v55 = vand.u32 2147483647, %v1157_v30  ;;  %v1296_v61 = vshrl.u32 %v274_v52, 5 }
  0xcb   :  { %v108_v40 = vclz %v952_v2  ;;  %v773_v31 = vsel %vm771_vm2, %v772_v24, %v1276_v17  ;;  %v277_v27 = vsub.s32 32, %v276_v39  ;;  %v969_v43 = vadd.s32 4294967294, %v556_v34 }
  0xcc   :  { %v774_v35 = vadd.s32 %v773_v31, %v769_v29  ;;  %v288_v5 = vshll.u32 %v1098_v48, %v276_v39  ;;  %v291_v11 = vshll.u32 %v1099_v50, %v276_v39  ;;  %vm42_vm5 = vcmp.lt.s32.totalorder %v1143_v9, 0 }
  0xcd   :  { %v953_v36 = vadd.s32 4294967294, %v108_v40  ;;  %v289_v53 = vshrl.u32 %v1099_v50, %v277_v27  ;;  %v292_v54 = vshrl.u32 %v1100_v58, %v277_v27  ;;  %vm970_vm4 = vcmp.lt.s32.totalorder %v969_v43, 0 }
  0xce   :  { %v775_v33 = vadd.s32 536870912, %v774_v35  ;;  %v269_v1 = vand.u32 8388607, %v262_v55  ;;  %vm1308_vm6 = vcmp.le.f32.partialorder %v40_v12, 0.7853982  ;;  %v279_v50 = vshll.u32 %v1095_v42, %v276_v39 }
  0xcf   :  { %vm954_vm3 = vcmp.lt.s32.totalorder %v953_v36, 0  ;;  %v290_v58 = vor.u32 %v289_v53, %v288_v5  ;;  %v293_v0 = vor.u32 %v292_v54, %v291_v11  ;;  %v280_v7 = vshrl.u32 %v1096_v44, %v277_v27 }
  0xd0   :  { %v111_v41 = vsel %vm954_vm3, 0, %v953_v36  ;;  %v1290_v49 = vshrl.u32 %v775_v33, 30  ;;  %v1314_v13 = vsel %vm970_vm4, 0, %v969_v43  ;;  %vm297_vm7 = vcmp.lt.s32.totalorder %v1296_v61, 4 }
  0xd1   :  { %v112_v45 = vsub.s32 32, %v111_v41  ;;  %v116_v47 = vsub.s32 4294967266, %v111_v41  ;;  %v113_v56 = vshll.u32 %v104_v4, %v111_v41  ;;  %v282_v17 = vshll.u32 %v1096_v44, %v276_v39 }
  0xd2   :  { %v777_v60 = vshll.u32 %v1290_v49, 30  ;;  %v281_v22 = vor.u32 %v280_v7, %v279_v50  ;;  %v283_v12 = vshrl.u32 %v1097_v46, %v277_v27  ;;  %v307_v23 = vsel %vm297_vm7, %v293_v0, 1326507024 }
  0xd3   :  { %v114_v37 = vshrl.u32 %v96_v38, %v112_v45  ;;  %v117_v57 = vadd.s32 127, %v116_v47  ;;  %v126_v2 = vsub.s32 4, %v1266_v32  ;;  %v285_v52 = vshll.u32 %v1097_v46, %v276_v39 }
  0xd4   :  { %v1300_v59 = vsub.s32 %v774_v35, %v777_v60  ;;  %v286_v24 = vshrl.u32 %v1098_v48, %v277_v27  ;;  %v303_v29 = vsel %vm297_vm7, %v290_v58, 920167782  ;;  %v270_v44 = vor.u32 8388608, %v269_v1 }
  0xd5   :  { %v115_v62 = vor.u32 %v114_v37, %v113_v56  ;;  %v118_v63 = vshll.u32 %v117_v57, 23  ;;  %v284_v31 = vor.u32 %v283_v12, %v282_v17  ;;  %vm294_vm8 = vcmp.lt.s32.totalorder %v1296_v61, 1 }
  0xd6   :  { %v780_v4 = vsub.s32 0, %v1300_v59  ;;  %v287_v36 = vor.u32 %v286_v24, %v285_v52  ;;  %vm296_vm9 = vcmp.lt.s32.totalorder %v1296_v61, 3  ;;  %v564_v35 = vsub.s32 4294967266, %v1314_v13 }
  0xd7   :  { %v119_v3 = vor.u32 4788187, %v118_v63  ;;  %v122_v15 = vcvt.s32.f32 %v115_v62  ;;  %v302_v46 = vsel %vm294_vm8, %v281_v22, %v284_v31  ;;  %v308_v48 = vsel %vm296_vm9, %v290_v58, %v307_v23 }
  0xd8   :  { %v976_v20 = vmin.u32 %v780_v4, %v1300_v59  ;;  %v127_v39 = vsel %vm42_vm5, %v126_v2, %v1266_v32  ;;  %v278_v38 = vshrl.u32 %v1095_v42, %v277_v27  ;;  %v304_v41 = vsel %vm296_vm9, %v287_v36, %v303_v29 }
  0xd9   :  { %v120_v18 = vand.u32 2147483647, %v119_v3  ;;  %v306_v43 = vsel %vm294_vm8, %v284_v31, %v287_v36  ;;  %vm295_vm10 = vcmp.lt.s32.totalorder %v1296_v61, 2  ;;  %v299_v47 = vsel %vm297_vm7, %v287_v36, 2102212464 }
  0xda   :  { %v782_v34 = vclz %v976_v20  ;;  %v310_v53 = vshll.u32 %v270_v44, 8  ;;  %v305_v32 = vsel %vm295_vm10, %v302_v46, %v304_v41  ;;  %v309_v27 = vsel %vm295_vm10, %v306_v43, %v308_v48 }
  0xdb   :  { %v123_v40 = vmul.f32 %v122_v15, %v120_v18  ;;  %v129_v56 = vsel %vm1308_vm6, 0, %v127_v39  ;;  %v298_v37 = vsel %vm294_vm8, %v278_v38, %v281_v22  ;;  %v300_v57 = vsel %vm296_vm9, %v284_v31, %v299_v47 }
  0xdc   :  { %v977_v54 = vadd.s32 4294967294, %v782_v34  ;;  %v1360_v60 = vmul.u32.u64.low %v310_v53, %v309_v27  ;;  %v1361_v5 = vmul.u32.u64.high %v310_v53, %v309_v27, %v1360_v60  ;;  %v565_v63 = vadd.s32 127, %v564_v35 }
  0xdd   :  { %v124_v33 = vxor.u32 2147483648, %v123_v40  ;;  %v1363_v11 = vmul.u32.u64.low %v310_v53, %v305_v32  ;;  %v1364_v62 = vmul.u32.u64.high %v310_v53, %v305_v32, %v1363_v11  ;;  %v238_v58 = vadd.s32 3, %v129_v56 }
  0xde   :  { %vm978_vm11 = vcmp.lt.s32.totalorder %v977_v54, 0  ;;  %v301_v0 = vsel %vm295_vm10, %v298_v37, %v300_v57  ;;  %v560_v1 = vsub.s32 32, %v1314_v13  ;;  %v566_v6 = vshll.u32 %v565_v63, 23 }
  0xdf   :  { %v125_v45 = vsel %vm42_vm5, %v124_v33, %v123_v40  ;;  %vm319_vm12 = vc.u32 %v1361_v5, %v1363_v11  ;;  %v785_v3 = vsel %vm978_vm11, 0, %v977_v54  ;;  %v320_v4 = vadd.s32 1, %v1364_v62 }
  0xe0   :  { %v128_v42 = vsel %vm1308_vm6, %v1143_v9, %v125_v45  ;;  %v133_v50 = vand.u32 3, %v129_v56  ;;  %v317_v7 = vmul.u32 %v310_v53, %v301_v0  ;;  %v544_v15 = vadd.s32 %v1204_v26, %v1201_v25 }
  0xe1   :  { %1024 = vcosq.f32 %v128_v42  ;;  %v239_v17 = vand.u32 3, %v238_v58  ;;  %v321_v18 = vsel %vm319_vm12, %v320_v4, %v1364_v62  ;;  %v790_v20 = vsub.s32 4294967266, %v785_v3 }
  0xe2   :  { %1026 = vsinq.f32 %v128_v42  ;;  %v322_v61 = vadd.s32 %v321_v18, %v317_v7  ;;  %v561_v12 = vshll.u32 %v1263_v51, %v1314_v13  ;;  %v562_v23 = vshrl.u32 %v544_v15, %v560_v1 }
  0xe3   :  { %vm132_vm13 = vweird.f32 %v1143_v9  ;;  %vm143_vm14 = vcmask 130048   ;;  %v567_v52 = vor.u32 4788187, %v566_v6  ;;  %vm135_vm15 = vcmp.eq.s32.totalorder %v133_v50, 0 }
  0xe4   :  { %v323_v40 = vadd.s32 536870912, %v322_v61  ;;  %vm138_vm0 = vcmp.eq.s32.totalorder %v133_v50, 2  ;;  %vm241_vm1 = vcmp.eq.s32.totalorder %v239_v17, 0  ;;  %vm244_vm2 = vcmp.eq.s32.totalorder %v239_v17, 2 }
  0xe5   :  { %v791_v25 = vadd.s32 127, %v790_v20  ;;  %vm134_vm3 = vcmp.lt.s32.totalorder %v133_v50, 2  ;;  %vm240_vm4 = vcmp.lt.s32.totalorder %v239_v17, 2  ;;  %v786_v34 = vsub.s32 32, %v785_v3 }
  0xe6   :  { %v1379_v31 = vshrl.u32 %v323_v40, 30  ;;  %v563_v39 = vor.u32 %v562_v23, %v561_v12  ;;  %v770_v38 = vadd.s32 %v1275_v16, %v1280_v21  ;;  %v568_v45 = vand.u32 2147483647, %v567_v52 }
  0xe7   :  { %v792_v41 = vshll.u32 %v791_v25, 23  ;;  %v787_v42 = vshll.u32 %v1300_v59, %v785_v3  ;;  %v318_v58 = vadd.s32 %v1363_v11, %v1361_v5  ;;  %vm490_vm6 = vcmp.lt.s32.totalorder %v1141_v8, 0 }
  0xe8   :  { %v325_v33 = vshll.u32 %v1379_v31, 30  ;;  %v788_v47 = vshrl.u32 %v770_v38, %v786_v34  ;;  %v570_v54 = vcvt.s32.f32 %v563_v39  ;;  %vm1397_vm7 = vcmp.le.f32.partialorder %v488_v10, 0.7853982 }
  0xe9   :  { %v793_v32 = vor.u32 4788187, %v792_v41  ;;  %vm716_vm8 = vcmp.lt.s32.totalorder %v1153_v19, 0  ;;  %v574_v18 = vsub.s32 4, %v1240_v14  ;;  %v348_v12 = vsub.s32 4, %v1379_v31 }
  0xea   :  { %v326_v43 = vsub.s32 %v322_v61, %v325_v33  ;;  %v571_v9 = vmul.f32 %v570_v54, %v568_v45  ;;  %v789_v56 = vor.u32 %v788_v47, %v787_v42  ;;  %vm1411_vm9 = vcmp.le.f32.partialorder %v714_v28, 0.7853982 }
  0xeb   :  { %v1025_v22 = vpop.eup %1024  ;;  %v794_v57 = vand.u32 2147483647, %v793_v32  ;;  %vm263_vm10 = vcmp.le.f32.partialorder %v262_v55, 0.7853982  ;;  %vm264_vm11 = vcmp.lt.s32.totalorder %v1157_v30, 0  ;;  %v800_v40 = vsub.s32 4, %v1290_v49 }
  0xec   :  { %v1027_v2 = vpop.eup %1026  ;;  %v139_v24 = vxor.u32 2147483648, %v1025_v22  ;;  %v328_v53 = vsub.s32 0, %v326_v43  ;;  %v572_v16 = vxor.u32 2147483648, %v571_v9  ;;  %v796_v21 = vcvt.s32.f32 %v789_v56 }
  0xed   :  { %v136_v29 = vxor.u32 2147483648, %v1027_v2  ;;  %v801_v55 = vsel %vm716_vm8, %v800_v40, %v1290_v49  ;;  %vm354_vm12 = vweird.f32 %v1157_v30 }
  0xee   :  { %v246_v26 = vsel %vm244_vm2, %v139_v24, %v1027_v2  ;;  %v140_v44 = vsel %vm138_vm0, %v139_v24, %v1027_v2  ;;  %v960_v27 = vmin.u32 %v328_v53, %v326_v43  ;;  %v797_v63 = vmul.f32 %v796_v21, %v794_v57 }
  0xef   :  { %v243_v51 = vsel %vm241_vm1, %v1025_v22, %v136_v29  ;;  %v137_v13 = vsel %vm135_vm15, %v1025_v22, %v136_v29  ;;  %v573_v59 = vsel %vm490_vm6, %v572_v16, %v571_v9  ;;  %v575_v2 = vsel %vm490_vm6, %v574_v18, %v1240_v14 }
  0xf0   :  { %v247_v36 = vsel %vm240_vm4, %v243_v51, %v246_v26  ;;  %v141_v35 = vsel %vm134_vm3, %v137_v13, %v140_v44  ;;  %v330_v37 = vclz %v960_v27  ;;  %v798_v50 = vxor.u32 2147483648, %v797_v63 }
  0xf1   :  { %v248_v46 = vsel %vm132_vm13, nan, %v247_v36  ;;  %v142_v48 = vsel %vm132_vm13, nan, %v141_v35  ;;  %v576_v5 = vsel %vm1397_vm7, %v1141_v8, %v573_v59  ;;  %v349_v29 = vsel %vm264_vm11, %v348_v12, %v1379_v31 }
  0xf2   :  { %250 = vrot.lane.b32.xlu1 %v248_v46, %s1101_s0  ;;  %144 = vst.msk [vmem:[#allocation5] sm:$0xff] %vm143_vm14, %v142_v48  ;;  %v961_v60 = vadd.s32 4294967294, %v330_v37  ;;  %v799_v20 = vsel %vm716_vm8, %v798_v50, %v797_v63  ;;  %1028 = vcosq.f32 %v576_v5  ;;  %v577_v25 = vsel %vm1397_vm7, 0, %v575_v2 }
  0xf3   :  { %1030 = vsinq.f32 %v576_v5  ;;  %v802_v52 = vsel %vm1411_vm9, %v1153_v19, %v799_v20  ;;  %v351_v26 = vsel %vm263_vm10, 0, %v349_v29  ;;  %v690_v44 = vadd.s32 3, %v577_v25 }
  0xf4   :  { %vm962_vm5 = vcmp.lt.s32.totalorder %v961_v60, 0  ;;  %1032 = vcosq.f32 %v802_v52  ;;  %v464_v34 = vadd.s32 3, %v351_v26  ;;  %v803_v31 = vsel %vm1411_vm9, 0, %v801_v55 }
  0xf5   :  { %v333_v62 = vsel %vm962_vm5, 0, %v961_v60  ;;  %1034 = vsinq.f32 %v802_v52  ;;  %v581_v36 = vand.u32 3, %v577_v25  ;;  %v691_v35 = vand.u32 3, %v690_v44 }
  0xf6   :  { %v334_v0 = vsub.s32 32, %v333_v62  ;;  %v338_v1 = vsub.s32 4294967266, %v333_v62  ;;  %v335_v3 = vshll.u32 %v326_v43, %v333_v62  ;;  %v355_v48 = vand.u32 3, %v351_v26 }
  0xf7   :  { %v916_v39 = vadd.s32 3, %v803_v31  ;;  %v465_v41 = vand.u32 3, %v464_v34  ;;  %vm583_vm13 = vcmp.eq.s32.totalorder %v581_v36, 0  ;;  %vm586_vm14 = vcmp.eq.s32.totalorder %v581_v36, 2 }
  0xf8   :  { %v336_v4 = vshrl.u32 %v318_v58, %v334_v0  ;;  %v339_v6 = vadd.s32 127, %v338_v1  ;;  %vm693_vm15 = vcmp.eq.s32.totalorder %v691_v35, 0  ;;  %vm696_vm0 = vcmp.eq.s32.totalorder %v691_v35, 2 }
  0xf9   :  { %v807_v54 = vand.u32 3, %v803_v31  ;;  %vm356_vm1 = vcmp.lt.s32.totalorder %v355_v48, 2  ;;  %v917_v9 = vand.u32 3, %v916_v39  ;;  %vm357_vm2 = vcmp.eq.s32.totalorder %v355_v48, 0 }
  0xfa   :  { %v337_v7 = vor.u32 %v336_v4, %v335_v3  ;;  %v340_v15 = vshll.u32 %v339_v6, 23  ;;  %vm360_vm3 = vcmp.eq.s32.totalorder %v355_v48, 2  ;;  %vm470_vm4 = vcmp.eq.s32.totalorder %v465_v41, 2 }
  0xfb   :  { %vm466_vm5 = vcmp.lt.s32.totalorder %v465_v41, 2  ;;  %vm467_vm6 = vcmp.eq.s32.totalorder %v465_v41, 0  ;;  %vm582_vm7 = vcmp.lt.s32.totalorder %v581_v36, 2  ;;  %vm692_vm8 = vcmp.lt.s32.totalorder %v691_v35, 2 }
  0xfc   :  { %v341_v11 = vor.u32 4788187, %v340_v15  ;;  %v344_v22 = vcvt.s32.f32 %v337_v7  ;;  %v1029_v51 = vpop.eup %1028  ;;  %vm809_vm9 = vcmp.eq.s32.totalorder %v807_v54, 0 }
  0xfd   :  { %v1031_v13 = vpop.eup %1030  ;;  %v587_v46 = vxor.u32 2147483648, %v1029_v51 }
  0xfe   :  { %v342_v61 = vand.u32 2147483647, %v341_v11  ;;  %v584_v33 = vxor.u32 2147483648, %v1031_v13  ;;  %v1033_v38 = vpop.eup %1032 }
  0xff   :  { %v1035_v43 = vpop.eup %1034  ;;  %v588_v47 = vsel %vm586_vm14, %v587_v46, %v1031_v13  ;;  %v698_v53 = vsel %vm696_vm0, %v587_v46, %v1031_v13  ;;  %v813_v62 = vxor.u32 2147483648, %v1033_v38  ;;  %vm580_vm14 = vweird.f32 %v1141_v8 }
 0x100   :  { %v345_v10 = vmul.f32 %v344_v22, %v342_v61  ;;  %v585_v45 = vsel %vm583_vm13, %v1029_v51, %v584_v33  ;;  %v695_v27 = vsel %vm693_vm15, %v1029_v51, %v584_v33  ;;  %v810_v21 = vxor.u32 2147483648, %v1035_v43 }
 0x101   :  { %v589_v59 = vsel %vm582_vm7, %v585_v45, %v588_v47  ;;  %v699_v3 = vsel %vm692_vm8, %v695_v27, %v698_v53  ;;  %vm922_vm13 = vcmp.eq.s32.totalorder %v917_v9, 2  ;;  %vm808_vm15 = vcmp.lt.s32.totalorder %v807_v54, 2 }
 0x102   :  { %v346_v24 = vxor.u32 2147483648, %v345_v10  ;;  %v811_v4 = vsel %vm809_vm9, %v1033_v38, %v810_v21  ;;  %v924_v7 = vsel %vm922_vm13, %v813_v62, %v1035_v43  ;;  %v590_v15 = vsel %vm580_vm14, nan, %v589_v59 }
 0x103   :  { %v700_v17 = vsel %vm580_vm14, nan, %v699_v3  ;;  %vm806_vm0 = vweird.f32 %v1153_v19  ;;  %vm931_vm7 = vcmask 1048448  }
 0x104   :  { %v347_v28 = vsel %vm264_vm11, %v346_v24, %v345_v10  ;;  %vm919_vm11 = vcmp.eq.s32.totalorder %v917_v9, 0 }
 0x105   :  { %v350_v14 = vsel %vm263_vm10, %v1157_v30, %v347_v28  ;;  %vm812_vm10 = vcmp.eq.s32.totalorder %v807_v54, 2  ;;  %v921_v50 = vsel %vm919_vm11, %v1033_v38, %v810_v21 }
 0x106   :  { %1036 = vcosq.f32 %v350_v14  ;;  %v814_v6 = vsel %vm812_vm10, %v813_v62, %v1035_v43 }
 0x107   :  { %1038 = vsinq.f32 %v350_v14  ;;  %v815_v30 = vsel %vm808_vm15, %v811_v4, %v814_v6 }
 0x108   :  { %v816_v11 = vsel %vm806_vm0, nan, %v815_v30 }
 0x110   :  { %v1037_v49 = vpop.eup %1036 }
 0x111   :  { %v1039_v42 = vpop.eup %1038  ;;  %v361_v32 = vxor.u32 2147483648, %v1037_v49 }
 0x112   :  { %v358_v56 = vxor.u32 2147483648, %v1039_v42 }
 0x113   :  { %v362_v37 = vsel %vm360_vm3, %v361_v32, %v1039_v42  ;;  %v472_v57 = vsel %vm470_vm4, %v361_v32, %v1039_v42  ;;  %vm479_vm3 = vcmask 523648   ;;  %vm595_vm4 = vcmask 654848  }
 0x114   :  { %v359_v60 = vsel %vm357_vm2, %v1037_v49, %v358_v56  ;;  %v469_v16 = vsel %vm467_vm6, %v1037_v49, %v358_v56  ;;  %vm369_vm2 = vcmask 392448   ;;  %vm821_vm6 = vcmask 917248  }
 0x115   :  { %v363_v63 = vsel %vm356_vm1, %v359_v60, %v362_v37  ;;  %v473_v58 = vsel %vm466_vm5, %v469_v16, %v472_v57  ;;  %vm253_vm1 = vcmask 261248   ;;  %vm705_vm5 = vcmask 786048  }
 0x116   :  { %v364_v0 = vsel %vm354_vm12, nan, %v363_v63  ;;  %v474_v1 = vsel %vm354_vm12, nan, %v473_v58  ;;  %vm918_vm12 = vcmp.lt.s32.totalorder %v917_v9, 2 }
 0x117   :  { %366 = vrot.lane.b32.xlu0 %v364_v0, %s1089_s20  ;;  %476 = vrot.lane.b32.xlu1 %v474_v1, %s1102_s1  ;;  %v925_v5 = vsel %vm918_vm12, %v921_v50, %v924_v7 }
 0x118   :  { %v926_v18 = vsel %vm806_vm0, nan, %v925_v5 }
 0x11b   :  { %592 = vrot.lane.b32.xlu0 %v590_v15, %s1103_s26  ;;  %702 = vrot.lane.b32.xlu1 %v700_v17, %s1104_s27 }
 0x11f   :  { %818 = vrot.lane.b32.xlu0 %v816_v11, %s1105_s28  ;;  %928 = vrot.lane.b32.xlu1 %v926_v18, %s1106_s29 }
 0x164   :  { %v251_v8 = vpop.permute.xlu1 %250 }
 0x165   :  { %254 = vst.msk [vmem:[#allocation5] sm:$0xff] %vm253_vm1, %v251_v8 }
 0x189   :  { %v367_v20 = vpop.permute.xlu0 %366  ;;  %v477_v61 = vpop.permute.xlu1 %476 }
 0x18a   :  { %370 = vst.msk [vmem:[#allocation5] sm:$0xff] %vm369_vm2, %v367_v20 }
 0x18b   :  { %480 = vst.msk [vmem:[#allocation5] sm:$0xff] %vm479_vm3, %v477_v61 }
 0x18d   :  { %v593_v22 = vpop.permute.xlu0 %592  ;;  %v703_v10 = vpop.permute.xlu1 %702 }
 0x18e   :  { %596 = vst.msk [vmem:[#allocation5] sm:$0xff] %vm595_vm4, %v593_v22 }
 0x18f   :  { %706 = vst.msk [vmem:[#allocation5] sm:$0xff] %vm705_vm5, %v703_v10 }
 0x191   :  { %v819_v19 = vpop.permute.xlu0 %818  ;;  %v929_v12 = vpop.permute.xlu1 %928 }
 0x192   :  { %822 = vst.msk [vmem:[#allocation5] sm:$0xff] %vm821_vm6, %v819_v19 }
 0x193   :  { %932 = vst.msk [vmem:[#allocation5] sm:$0xff] %vm931_vm7, %v929_v12 }
 0x194   :  { %937 = vsyncadd [#allocation4], 96  ;;  %s1107_s30 = smov [#allocation5]  }
 0x195   :  { %s938_s3 = sshll.u32 %s1107_s30, 4  ;;  %s939_s3 = int_to_ptr.vmem [resolvable:$true] %s938_s3 }
 0x196   :  { %s1062_s4 = scalar_lea.vmem %s939_s3, 32  ;;  %s1066_s5 = scalar_lea.vmem %s939_s3, 128 }
 0x197   :  { %p1063_p8 = scmp.ne.s32.totalorder %s939_s3, %s1062_s4  ;;  %p1067_p9 = scmp.lt.s32.totalorder %s939_s3, %s939_s3 }
 0x198   :  { %p1068_p10 = scmp.lt.s32.totalorder %s1066_s5, %s1062_s4 }
 0x19a   :  { %p1069_p11 = por %p1068_p10, %p1067_p9 }
 0x19c   :  { %p1070_p12 = pnand %p1069_p11, %p1063_p8 }
 0x19e   :  { %1073 = shalt.err (!%p1070_p12)
}
 0x19f   :  { %s1074_s8 = scalar_lea.hbm %s1460_s2, 32 }
 0x1a0   :  { %p1075_p13 = scmp.ne.s32.totalorder %s1460_s2, %s1074_s8  ;;  %p1078_p0 = scmp.lt.u32.totalorder %s1074_s8, %s1460_s2 }
 0x1a2   :  { %p1080_p1 = pnand %p1078_p0, %p1075_p13 }
 0x1a4   :  { %1083 = shalt.err (!%p1080_p1)
}
 0x1a5   :  { %944 = dma.vmem_to_hbm [thread:$0]  %s939_s3, 32, %s1460_s2, [#allocation4], %s1089_s20, %s1089_s20, %s1090_s21  }
 0x1a6   :  { %1086 = dma.done.wait [#allocation4], 128  }
 0x1a7   :  { %1087 = vsyncadd [#allocation4], 4294967168 }
 0x1a8   :  { %948 = vsyncpa [#allocation3], 1 }
 0x1a9   :  { %949 = vsyncpa [#allocation4], 1 }

</bundles_post_ra>
